<compile_context>
chip_gen: v7x
topology: tpu7x:2x2x1
jax: 0.10.0
libtpu: 0.0.40
codegen_flags: <defaults>
</compile_context>

<pallas_src>
import functools

import jax
import jax.numpy as jnp
from jax.experimental import pallas as pl
from jax.experimental.pallas import tpu as pltpu


_SUBLANE = 8
_LANE = 128
_KC_MAX = 256                    # max in_features per grid step (bounds unroll)
_TO_CANDIDATES = (512, 384, 256, 128)   # lane-dense output tile widths


def _round_up(x, m):
    return ((x + m - 1) // m) * m


def _tiles(in_features, out_features):
    """Pick (Kc, K_pad, TO, O_pad) tile sizes (all (8,128)-rule compliant)."""
    k8 = _round_up(in_features, _SUBLANE)
    if k8 <= _KC_MAX:
        kc, k_pad = k8, k8               # single K step, block == full dim
    else:
        kc = _KC_MAX                     # multiple of 128 -> legal lane tile
        k_pad = _round_up(in_features, kc)
    o_pad = _round_up(out_features, _LANE)
    to = next(t for t in _TO_CANDIDATES if o_pad % t == 0)
    return kc, k_pad, to, o_pad


def _quasi_kernel(x_ref, wt_ref, o_ref, acc_ref, sig_ref):
    """One (O-tile, K-tile) grid step.

    x_ref  : (B_pad, Kc)   batch on sublanes, K chunk on lanes
    wt_ref : (Kc, TO)      K chunk on sublanes, out_features on lanes (W^T)
    o_ref  : (B_pad, TO)   lane-dense output tile
    acc_ref: (B_pad, TO)   f32 running product, resident across the K grid axis
    sig_ref: (Kc, TO)      f32 sigmoid(weight chunk)
    """
    k_step = pl.program_id(1)

    @pl.when(k_step == 0)
    def _init():
        acc_ref[...] = jnp.ones_like(acc_ref)

    # Dense sigmoid of the whole weight chunk once per step (EUP, full vregs)
    # instead of per-row transcendentals inside the k loop.
    sig_ref[...] = jax.nn.sigmoid(wt_ref[...].astype(jnp.float32))

    u = 1.0 - x_ref[...].astype(jnp.float32)            # (B_pad, Kc)
    kc = x_ref.shape[1]

    acc = acc_ref[...]
    # Multiply-reduction over the K chunk.  Kc is bounded by _KC_MAX via the
    # K grid axis, so this static unroll stays small regardless of total K.
    # Each step is a rank-1 factor update: 3 VALU ops + 2 broadcasts.
    for k in range(kc):
        u_k = u[:, k:k + 1]               # (B_pad, 1) -> lane broadcast
        s_k = sig_ref[k:k + 1, :]         # (1, TO)    -> sublane broadcast
        acc = acc * (1.0 - u_k * s_k)
    acc_ref[...] = acc

    @pl.when(k_step == pl.num_programs(1) - 1)
    def _finalize():
        o_ref[...] = acc.astype(o_ref.dtype)


def prepare_quasi_weight(weight, *, dtype=None):
    """Init-time weight prep: transpose (O, K) -> (K, O) and pad to the tile grid.

    Call this once when parameters are created/updated, NOT per forward call,
    so the transpose + pad (a full HBM pass over the weight) is amortized.
    Optionally pass dtype=jnp.bfloat16 to halve weight HBM traffic; the kernel
    upcasts to f32 before the sigmoid.
    """
    out_features, in_features = weight.shape
    _, k_pad, _, o_pad = _tiles(in_features, out_features)
    wt = jnp.pad(weight.T, ((0, k_pad - in_features), (0, o_pad - out_features)))
    if dtype is not None:
        wt = wt.astype(dtype)
    return wt


@functools.partial(jax.jit, static_argnames=("out_features",))
def quasi_forward(x, wt_padded, out_features):
    """x: (B, K) or (K,); wt_padded: prepare_quasi_weight(W) with W of shape (O, K)."""
    if x.ndim == 1:
        x = x[None, :]
    b, in_features = x.shape
    kc, k_pad, to, o_pad = _tiles(in_features, out_features)
    assert wt_padded.shape == (k_pad, o_pad), (wt_padded.shape, (k_pad, o_pad))

    b_pad = _round_up(max(b, _SUBLANE), _SUBLANE)
    # K padding uses x == 1  ->  (1 - x) == 0  ->  factor == 1 (identity).
    xp = jnp.pad(x, ((0, b_pad - b), (0, k_pad - in_features)),
                 constant_values=1.0)

    grid = (o_pad // to, k_pad // kc)

    out = pl.pallas_call(
        _quasi_kernel,
        out_shape=jax.ShapeDtypeStruct((b_pad, o_pad), x.dtype),
        grid_spec=pltpu.PrefetchScalarGridSpec(
            num_scalar_prefetch=0,
            grid=grid,
            in_specs=[
                pl.BlockSpec((b_pad, kc), lambda j, k: (0, k)),   # x
                pl.BlockSpec((kc, to), lambda j, k: (k, j)),      # W^T
            ],
            out_specs=pl.BlockSpec((b_pad, to), lambda j, k: (0, j)),
            scratch_shapes=[
                pltpu.VMEM((b_pad, to), jnp.float32),   # running product
                pltpu.VMEM((kc, to), jnp.float32),      # sigmoid(weight chunk)
            ],
        ),
        compiler_params=pltpu.CompilerParams(
            # O tiles are independent (sharded across TCs on v7x); K is the
            # reduction axis and stays sequential ("arbitrary", last).
            dimension_semantics=("parallel", "arbitrary"),
            # Blocks + scratch total well under 2 MiB with these tile caps, so
            # this limit is safe on every generation (incl. v7x 64 MiB VMEM).
            vmem_limit_bytes=32 * 1024 * 1024,
        ),
    )(xp, wt_padded)

    return out[:b, :out_features]


if __name__ == "__main__":
    key = jax.random.PRNGKey(0)
    kx, kw = jax.random.split(key)

    batch, in_features, out_features = 4, 32, 16

    x = jax.random.normal(kx, (batch, in_features), dtype=jnp.float32)
    # nn.init.trunc_normal_(mean=0, std=1) == standard normal truncated at +-2
    weight = jax.random.truncated_normal(
        kw, -2.0, 2.0, (out_features, in_features), dtype=jnp.float32)

    wt_padded = prepare_quasi_weight(weight)      # once, at "init" time
    out = quasi_forward(x, wt_padded, out_features)
    out = jax.block_until_ready(out)

    # plain-JAX reference (PyTorch forward semantics)
    s = jax.nn.sigmoid(weight)                                     # (O, K)
    ref = jnp.prod(1.0 - s[None, :, :] * (1.0 - x[:, None, :]), axis=2)

    assert out.shape == (batch, out_features), out.shape
    err = float(jnp.max(jnp.abs(out - ref)))
    assert jnp.allclose(out, ref, atol=1e-5, rtol=1e-5), err

    print("KERNEL_OK")
</pallas_src>

<mosaic_0001>
module attributes {stable_mosaic.version = 11 : i64} {
  func.func @_quasi_kernel(%arg0: i32, %arg1: i32, %arg2: memref<8x32xf32, #tpu.memory_space<vmem>>, %arg3: memref<32x128xf32, #tpu.memory_space<vmem>>, %arg4: memref<8x128xf32, #tpu.memory_space<vmem>>, %arg5: memref<8x128xf32, #tpu.memory_space<vmem>>, %arg6: memref<32x128xf32, #tpu.memory_space<vmem>>) attributes {dimension_semantics = [#tpu.dimension_semantics<parallel>, #tpu.dimension_semantics<arbitrary>], iteration_bounds = array<i64: 1, 1>, scalar_prefetch = 0 : i64, scratch_operands = 2 : i64, tpu.core_type = #tpu.core_type<tc>, window_params = [{transform_indices = @transform_0, window_bounds = array<i64: 8, 32>}, {transform_indices = @transform_1, window_bounds = array<i64: 32, 128>}, {transform_indices = @transform_2, window_bounds = array<i64: 8, 128>}]} {
    %c0_i32 = arith.constant 0 : i32
    %0 = arith.cmpi eq, %arg1, %c0_i32 : i32
    %1 = arith.extui %0 : i1 to i32
    %c0_i32_0 = arith.constant 0 : i32
    %2 = arith.cmpi ne, %1, %c0_i32_0 : i32
    scf.if %2 {
      %cst_78 = arith.constant 1.000000e+00 : f32
      %274 = vector.broadcast %cst_78 : f32 to vector<8x128xf32>
      %c0_79 = arith.constant 0 : index
      %c0_80 = arith.constant 0 : index
      %275 = vector.load %arg5[%c0_79, %c0_80] : memref<8x128xf32, #tpu.memory_space<vmem>>, vector<8x128xf32>
      tpu.vector_store %arg5[%c0_79, %c0_80], %274 {strides = array<i32>} : memref<8x128xf32, #tpu.memory_space<vmem>>, vector<8x128xf32>,
    } else {
    }
    %c0 = arith.constant 0 : index
    %c0_1 = arith.constant 0 : index
    %3 = vector.load %arg3[%c0, %c0_1] : memref<32x128xf32, #tpu.memory_space<vmem>>, vector<32x128xf32>
    %4 = arith.negf %3 : vector<32x128xf32>
    %5 = math.exp %4 : vector<32x128xf32>
    %cst = arith.constant 1.000000e+00 : f32
    %6 = vector.broadcast %cst : f32 to vector<32x128xf32>
    %7 = arith.addf %6, %5 : vector<32x128xf32>
    %8 = arith.divf %6, %7 : vector<32x128xf32>
    %c0_2 = arith.constant 0 : index
    %c0_3 = arith.constant 0 : index
    %9 = vector.load %arg6[%c0_2, %c0_3] : memref<32x128xf32, #tpu.memory_space<vmem>>, vector<32x128xf32>
    tpu.vector_store %arg6[%c0_2, %c0_3], %8 {strides = array<i32>} : memref<32x128xf32, #tpu.memory_space<vmem>>, vector<32x128xf32>,
    %c0_4 = arith.constant 0 : index
    %c0_5 = arith.constant 0 : index
    %10 = vector.load %arg2[%c0_4, %c0_5] : memref<8x32xf32, #tpu.memory_space<vmem>>, vector<8x32xf32>
    %cst_6 = arith.constant 1.000000e+00 : f32
    %11 = vector.broadcast %cst_6 : f32 to vector<8x32xf32>
    %12 = arith.subf %11, %10 : vector<8x32xf32>
    %c0_7 = arith.constant 0 : index
    %c0_8 = arith.constant 0 : index
    %13 = vector.load %arg5[%c0_7, %c0_8] : memref<8x128xf32, #tpu.memory_space<vmem>>, vector<8x128xf32>
    %14 = vector.extract_strided_slice %12 {offsets = [0, 0], sizes = [8, 1], strides = [1, 1]} : vector<8x32xf32> to vector<8x1xf32>
    %c0_9 = arith.constant 0 : index
    %c0_10 = arith.constant 0 : index
    %15 = vector.load %arg6[%c0_9, %c0_10] : memref<32x128xf32, #tpu.memory_space<vmem>>, vector<1x128xf32>
    %16 = vector.broadcast %14 : vector<8x1xf32> to vector<8x128xf32>
    %17 = vector.broadcast %15 : vector<1x128xf32> to vector<8x128xf32>
    %18 = arith.mulf %16, %17 : vector<8x128xf32>
    %cst_11 = arith.constant 1.000000e+00 : f32
    %19 = vector.broadcast %cst_11 : f32 to vector<8x128xf32>
    %20 = arith.subf %19, %18 : vector<8x128xf32>
    %21 = arith.mulf %13, %20 : vector<8x128xf32>
    %22 = vector.extract_strided_slice %12 {offsets = [0, 1], sizes = [8, 1], strides = [1, 1]} : vector<8x32xf32> to vector<8x1xf32>
    %c1 = arith.constant 1 : index
    %c0_12 = arith.constant 0 : index
    %23 = vector.load %arg6[%c1, %c0_12] : memref<32x128xf32, #tpu.memory_space<vmem>>, vector<1x128xf32>
    %24 = vector.broadcast %22 : vector<8x1xf32> to vector<8x128xf32>
    %25 = vector.broadcast %23 : vector<1x128xf32> to vector<8x128xf32>
    %26 = arith.mulf %24, %25 : vector<8x128xf32>
    %cst_13 = arith.constant 1.000000e+00 : f32
    %27 = vector.broadcast %cst_13 : f32 to vector<8x128xf32>
    %28 = arith.subf %27, %26 : vector<8x128xf32>
    %29 = arith.mulf %21, %28 : vector<8x128xf32>
    %30 = vector.extract_strided_slice %12 {offsets = [0, 2], sizes = [8, 1], strides = [1, 1]} : vector<8x32xf32> to vector<8x1xf32>
    %c2 = arith.constant 2 : index
    %c0_14 = arith.constant 0 : index
    %31 = vector.load %arg6[%c2, %c0_14] : memref<32x128xf32, #tpu.memory_space<vmem>>, vector<1x128xf32>
    %32 = vector.broadcast %30 : vector<8x1xf32> to vector<8x128xf32>
    %33 = vector.broadcast %31 : vector<1x128xf32> to vector<8x128xf32>
    %34 = arith.mulf %32, %33 : vector<8x128xf32>
    %cst_15 = arith.constant 1.000000e+00 : f32
    %35 = vector.broadcast %cst_15 : f32 to vector<8x128xf32>
    %36 = arith.subf %35, %34 : vector<8x128xf32>
    %37 = arith.mulf %29, %36 : vector<8x128xf32>
    %38 = vector.extract_strided_slice %12 {offsets = [0, 3], sizes = [8, 1], strides = [1, 1]} : vector<8x32xf32> to vector<8x1xf32>
    %c3 = arith.constant 3 : index
    %c0_16 = arith.constant 0 : index
    %39 = vector.load %arg6[%c3, %c0_16] : memref<32x128xf32, #tpu.memory_space<vmem>>, vector<1x128xf32>
    %40 = vector.broadcast %38 : vector<8x1xf32> to vector<8x128xf32>
    %41 = vector.broadcast %39 : vector<1x128xf32> to vector<8x128xf32>
    %42 = arith.mulf %40, %41 : vector<8x128xf32>
    %cst_17 = arith.constant 1.000000e+00 : f32
    %43 = vector.broadcast %cst_17 : f32 to vector<8x128xf32>
    %44 = arith.subf %43, %42 : vector<8x128xf32>
    %45 = arith.mulf %37, %44 : vector<8x128xf32>
    %46 = vector.extract_strided_slice %12 {offsets = [0, 4], sizes = [8, 1], strides = [1, 1]} : vector<8x32xf32> to vector<8x1xf32>
    %c4 = arith.constant 4 : index
    %c0_18 = arith.constant 0 : index
    %47 = vector.load %arg6[%c4, %c0_18] : memref<32x128xf32, #tpu.memory_space<vmem>>, vector<1x128xf32>
    %48 = vector.broadcast %46 : vector<8x1xf32> to vector<8x128xf32>
    %49 = vector.broadcast %47 : vector<1x128xf32> to vector<8x128xf32>
    %50 = arith.mulf %48, %49 : vector<8x128xf32>
    %cst_19 = arith.constant 1.000000e+00 : f32
    %51 = vector.broadcast %cst_19 : f32 to vector<8x128xf32>
    %52 = arith.subf %51, %50 : vector<8x128xf32>
    %53 = arith.mulf %45, %52 : vector<8x128xf32>
    %54 = vector.extract_strided_slice %12 {offsets = [0, 5], sizes = [8, 1], strides = [1, 1]} : vector<8x32xf32> to vector<8x1xf32>
    %c5 = arith.constant 5 : index
    %c0_20 = arith.constant 0 : index
    %55 = vector.load %arg6[%c5, %c0_20] : memref<32x128xf32, #tpu.memory_space<vmem>>, vector<1x128xf32>
    %56 = vector.broadcast %54 : vector<8x1xf32> to vector<8x128xf32>
    %57 = vector.broadcast %55 : vector<1x128xf32> to vector<8x128xf32>
    %58 = arith.mulf %56, %57 : vector<8x128xf32>
    %cst_21 = arith.constant 1.000000e+00 : f32
    %59 = vector.broadcast %cst_21 : f32 to vector<8x128xf32>
    %60 = arith.subf %59, %58 : vector<8x128xf32>
    %61 = arith.mulf %53, %60 : vector<8x128xf32>
    %62 = vector.extract_strided_slice %12 {offsets = [0, 6], sizes = [8, 1], strides = [1, 1]} : vector<8x32xf32> to vector<8x1xf32>
    %c6 = arith.constant 6 : index
    %c0_22 = arith.constant 0 : index
    %63 = vector.load %arg6[%c6, %c0_22] : memref<32x128xf32, #tpu.memory_space<vmem>>, vector<1x128xf32>
    %64 = vector.broadcast %62 : vector<8x1xf32> to vector<8x128xf32>
    %65 = vector.broadcast %63 : vector<1x128xf32> to vector<8x128xf32>
    %66 = arith.mulf %64, %65 : vector<8x128xf32>
    %cst_23 = arith.constant 1.000000e+00 : f32
    %67 = vector.broadcast %cst_23 : f32 to vector<8x128xf32>
    %68 = arith.subf %67, %66 : vector<8x128xf32>
    %69 = arith.mulf %61, %68 : vector<8x128xf32>
    %70 = vector.extract_strided_slice %12 {offsets = [0, 7], sizes = [8, 1], strides = [1, 1]} : vector<8x32xf32> to vector<8x1xf32>
    %c7 = arith.constant 7 : index
    %c0_24 = arith.constant 0 : index
    %71 = vector.load %arg6[%c7, %c0_24] : memref<32x128xf32, #tpu.memory_space<vmem>>, vector<1x128xf32>
    %72 = vector.broadcast %70 : vector<8x1xf32> to vector<8x128xf32>
    %73 = vector.broadcast %71 : vector<1x128xf32> to vector<8x128xf32>
    %74 = arith.mulf %72, %73 : vector<8x128xf32>
    %cst_25 = arith.constant 1.000000e+00 : f32
    %75 = vector.broadcast %cst_25 : f32 to vector<8x128xf32>
    %76 = arith.subf %75, %74 : vector<8x128xf32>
    %77 = arith.mulf %69, %76 : vector<8x128xf32>
    %78 = vector.extract_strided_slice %12 {offsets = [0, 8], sizes = [8, 1], strides = [1, 1]} : vector<8x32xf32> to vector<8x1xf32>
    %c8 = arith.constant 8 : index
    %c0_26 = arith.constant 0 : index
    %79 = vector.load %arg6[%c8, %c0_26] : memref<32x128xf32, #tpu.memory_space<vmem>>, vector<1x128xf32>
    %80 = vector.broadcast %78 : vector<8x1xf32> to vector<8x128xf32>
    %81 = vector.broadcast %79 : vector<1x128xf32> to vector<8x128xf32>
    %82 = arith.mulf %80, %81 : vector<8x128xf32>
    %cst_27 = arith.constant 1.000000e+00 : f32
    %83 = vector.broadcast %cst_27 : f32 to vector<8x128xf32>
    %84 = arith.subf %83, %82 : vector<8x128xf32>
    %85 = arith.mulf %77, %84 : vector<8x128xf32>
    %86 = vector.extract_strided_slice %12 {offsets = [0, 9], sizes = [8, 1], strides = [1, 1]} : vector<8x32xf32> to vector<8x1xf32>
    %c9 = arith.constant 9 : index
    %c0_28 = arith.constant 0 : index
    %87 = vector.load %arg6[%c9, %c0_28] : memref<32x128xf32, #tpu.memory_space<vmem>>, vector<1x128xf32>
    %88 = vector.broadcast %86 : vector<8x1xf32> to vector<8x128xf32>
    %89 = vector.broadcast %87 : vector<1x128xf32> to vector<8x128xf32>
    %90 = arith.mulf %88, %89 : vector<8x128xf32>
    %cst_29 = arith.constant 1.000000e+00 : f32
    %91 = vector.broadcast %cst_29 : f32 to vector<8x128xf32>
    %92 = arith.subf %91, %90 : vector<8x128xf32>
    %93 = arith.mulf %85, %92 : vector<8x128xf32>
    %94 = vector.extract_strided_slice %12 {offsets = [0, 10], sizes = [8, 1], strides = [1, 1]} : vector<8x32xf32> to vector<8x1xf32>
    %c10 = arith.constant 10 : index
    %c0_30 = arith.constant 0 : index
    %95 = vector.load %arg6[%c10, %c0_30] : memref<32x128xf32, #tpu.memory_space<vmem>>, vector<1x128xf32>
    %96 = vector.broadcast %94 : vector<8x1xf32> to vector<8x128xf32>
    %97 = vector.broadcast %95 : vector<1x128xf32> to vector<8x128xf32>
    %98 = arith.mulf %96, %97 : vector<8x128xf32>
    %cst_31 = arith.constant 1.000000e+00 : f32
    %99 = vector.broadcast %cst_31 : f32 to vector<8x128xf32>
    %100 = arith.subf %99, %98 : vector<8x128xf32>
    %101 = arith.mulf %93, %100 : vector<8x128xf32>
    %102 = vector.extract_strided_slice %12 {offsets = [0, 11], sizes = [8, 1], strides = [1, 1]} : vector<8x32xf32> to vector<8x1xf32>
    %c11 = arith.constant 11 : index
    %c0_32 = arith.constant 0 : index
    %103 = vector.load %arg6[%c11, %c0_32] : memref<32x128xf32, #tpu.memory_space<vmem>>, vector<1x128xf32>
    %104 = vector.broadcast %102 : vector<8x1xf32> to vector<8x128xf32>
    %105 = vector.broadcast %103 : vector<1x128xf32> to vector<8x128xf32>
    %106 = arith.mulf %104, %105 : vector<8x128xf32>
    %cst_33 = arith.constant 1.000000e+00 : f32
    %107 = vector.broadcast %cst_33 : f32 to vector<8x128xf32>
    %108 = arith.subf %107, %106 : vector<8x128xf32>
    %109 = arith.mulf %101, %108 : vector<8x128xf32>
    %110 = vector.extract_strided_slice %12 {offsets = [0, 12], sizes = [8, 1], strides = [1, 1]} : vector<8x32xf32> to vector<8x1xf32>
    %c12 = arith.constant 12 : index
    %c0_34 = arith.constant 0 : index
    %111 = vector.load %arg6[%c12, %c0_34] : memref<32x128xf32, #tpu.memory_space<vmem>>, vector<1x128xf32>
    %112 = vector.broadcast %110 : vector<8x1xf32> to vector<8x128xf32>
    %113 = vector.broadcast %111 : vector<1x128xf32> to vector<8x128xf32>
    %114 = arith.mulf %112, %113 : vector<8x128xf32>
    %cst_35 = arith.constant 1.000000e+00 : f32
    %115 = vector.broadcast %cst_35 : f32 to vector<8x128xf32>
    %116 = arith.subf %115, %114 : vector<8x128xf32>
    %117 = arith.mulf %109, %116 : vector<8x128xf32>
    %118 = vector.extract_strided_slice %12 {offsets = [0, 13], sizes = [8, 1], strides = [1, 1]} : vector<8x32xf32> to vector<8x1xf32>
    %c13 = arith.constant 13 : index
    %c0_36 = arith.constant 0 : index
    %119 = vector.load %arg6[%c13, %c0_36] : memref<32x128xf32, #tpu.memory_space<vmem>>, vector<1x128xf32>
    %120 = vector.broadcast %118 : vector<8x1xf32> to vector<8x128xf32>
    %121 = vector.broadcast %119 : vector<1x128xf32> to vector<8x128xf32>
    %122 = arith.mulf %120, %121 : vector<8x128xf32>
    %cst_37 = arith.constant 1.000000e+00 : f32
    %123 = vector.broadcast %cst_37 : f32 to vector<8x128xf32>
    %124 = arith.subf %123, %122 : vector<8x128xf32>
    %125 = arith.mulf %117, %124 : vector<8x128xf32>
    %126 = vector.extract_strided_slice %12 {offsets = [0, 14], sizes = [8, 1], strides = [1, 1]} : vector<8x32xf32> to vector<8x1xf32>
    %c14 = arith.constant 14 : index
    %c0_38 = arith.constant 0 : index
    %127 = vector.load %arg6[%c14, %c0_38] : memref<32x128xf32, #tpu.memory_space<vmem>>, vector<1x128xf32>
    %128 = vector.broadcast %126 : vector<8x1xf32> to vector<8x128xf32>
    %129 = vector.broadcast %127 : vector<1x128xf32> to vector<8x128xf32>
    %130 = arith.mulf %128, %129 : vector<8x128xf32>
    %cst_39 = arith.constant 1.000000e+00 : f32
    %131 = vector.broadcast %cst_39 : f32 to vector<8x128xf32>
    %132 = arith.subf %131, %130 : vector<8x128xf32>
    %133 = arith.mulf %125, %132 : vector<8x128xf32>
    %134 = vector.extract_strided_slice %12 {offsets = [0, 15], sizes = [8, 1], strides = [1, 1]} : vector<8x32xf32> to vector<8x1xf32>
    %c15 = arith.constant 15 : index
    %c0_40 = arith.constant 0 : index
    %135 = vector.load %arg6[%c15, %c0_40] : memref<32x128xf32, #tpu.memory_space<vmem>>, vector<1x128xf32>
    %136 = vector.broadcast %134 : vector<8x1xf32> to vector<8x128xf32>
    %137 = vector.broadcast %135 : vector<1x128xf32> to vector<8x128xf32>
    %138 = arith.mulf %136, %137 : vector<8x128xf32>
    %cst_41 = arith.constant 1.000000e+00 : f32
    %139 = vector.broadcast %cst_41 : f32 to vector<8x128xf32>
    %140 = arith.subf %139, %138 : vector<8x128xf32>
    %141 = arith.mulf %133, %140 : vector<8x128xf32>
    %142 = vector.extract_strided_slice %12 {offsets = [0, 16], sizes = [8, 1], strides = [1, 1]} : vector<8x32xf32> to vector<8x1xf32>
    %c16 = arith.constant 16 : index
    %c0_42 = arith.constant 0 : index
    %143 = vector.load %arg6[%c16, %c0_42] : memref<32x128xf32, #tpu.memory_space<vmem>>, vector<1x128xf32>
    %144 = vector.broadcast %142 : vector<8x1xf32> to vector<8x128xf32>
    %145 = vector.broadcast %143 : vector<1x128xf32> to vector<8x128xf32>
    %146 = arith.mulf %144, %145 : vector<8x128xf32>
    %cst_43 = arith.constant 1.000000e+00 : f32
    %147 = vector.broadcast %cst_43 : f32 to vector<8x128xf32>
    %148 = arith.subf %147, %146 : vector<8x128xf32>
    %149 = arith.mulf %141, %148 : vector<8x128xf32>
    %150 = vector.extract_strided_slice %12 {offsets = [0, 17], sizes = [8, 1], strides = [1, 1]} : vector<8x32xf32> to vector<8x1xf32>
    %c17 = arith.constant 17 : index
    %c0_44 = arith.constant 0 : index
    %151 = vector.load %arg6[%c17, %c0_44] : memref<32x128xf32, #tpu.memory_space<vmem>>, vector<1x128xf32>
    %152 = vector.broadcast %150 : vector<8x1xf32> to vector<8x128xf32>
    %153 = vector.broadcast %151 : vector<1x128xf32> to vector<8x128xf32>
    %154 = arith.mulf %152, %153 : vector<8x128xf32>
    %cst_45 = arith.constant 1.000000e+00 : f32
    %155 = vector.broadcast %cst_45 : f32 to vector<8x128xf32>
    %156 = arith.subf %155, %154 : vector<8x128xf32>
    %157 = arith.mulf %149, %156 : vector<8x128xf32>
    %158 = vector.extract_strided_slice %12 {offsets = [0, 18], sizes = [8, 1], strides = [1, 1]} : vector<8x32xf32> to vector<8x1xf32>
    %c18 = arith.constant 18 : index
    %c0_46 = arith.constant 0 : index
    %159 = vector.load %arg6[%c18, %c0_46] : memref<32x128xf32, #tpu.memory_space<vmem>>, vector<1x128xf32>
    %160 = vector.broadcast %158 : vector<8x1xf32> to vector<8x128xf32>
    %161 = vector.broadcast %159 : vector<1x128xf32> to vector<8x128xf32>
    %162 = arith.mulf %160, %161 : vector<8x128xf32>
    %cst_47 = arith.constant 1.000000e+00 : f32
    %163 = vector.broadcast %cst_47 : f32 to vector<8x128xf32>
    %164 = arith.subf %163, %162 : vector<8x128xf32>
    %165 = arith.mulf %157, %164 : vector<8x128xf32>
    %166 = vector.extract_strided_slice %12 {offsets = [0, 19], sizes = [8, 1], strides = [1, 1]} : vector<8x32xf32> to vector<8x1xf32>
    %c19 = arith.constant 19 : index
    %c0_48 = arith.constant 0 : index
    %167 = vector.load %arg6[%c19, %c0_48] : memref<32x128xf32, #tpu.memory_space<vmem>>, vector<1x128xf32>
    %168 = vector.broadcast %166 : vector<8x1xf32> to vector<8x128xf32>
    %169 = vector.broadcast %167 : vector<1x128xf32> to vector<8x128xf32>
    %170 = arith.mulf %168, %169 : vector<8x128xf32>
    %cst_49 = arith.constant 1.000000e+00 : f32
    %171 = vector.broadcast %cst_49 : f32 to vector<8x128xf32>
    %172 = arith.subf %171, %170 : vector<8x128xf32>
    %173 = arith.mulf %165, %172 : vector<8x128xf32>
    %174 = vector.extract_strided_slice %12 {offsets = [0, 20], sizes = [8, 1], strides = [1, 1]} : vector<8x32xf32> to vector<8x1xf32>
    %c20 = arith.constant 20 : index
    %c0_50 = arith.constant 0 : index
    %175 = vector.load %arg6[%c20, %c0_50] : memref<32x128xf32, #tpu.memory_space<vmem>>, vector<1x128xf32>
    %176 = vector.broadcast %174 : vector<8x1xf32> to vector<8x128xf32>
    %177 = vector.broadcast %175 : vector<1x128xf32> to vector<8x128xf32>
    %178 = arith.mulf %176, %177 : vector<8x128xf32>
    %cst_51 = arith.constant 1.000000e+00 : f32
    %179 = vector.broadcast %cst_51 : f32 to vector<8x128xf32>
    %180 = arith.subf %179, %178 : vector<8x128xf32>
    %181 = arith.mulf %173, %180 : vector<8x128xf32>
    %182 = vector.extract_strided_slice %12 {offsets = [0, 21], sizes = [8, 1], strides = [1, 1]} : vector<8x32xf32> to vector<8x1xf32>
    %c21 = arith.constant 21 : index
    %c0_52 = arith.constant 0 : index
    %183 = vector.load %arg6[%c21, %c0_52] : memref<32x128xf32, #tpu.memory_space<vmem>>, vector<1x128xf32>
    %184 = vector.broadcast %182 : vector<8x1xf32> to vector<8x128xf32>
    %185 = vector.broadcast %183 : vector<1x128xf32> to vector<8x128xf32>
    %186 = arith.mulf %184, %185 : vector<8x128xf32>
    %cst_53 = arith.constant 1.000000e+00 : f32
    %187 = vector.broadcast %cst_53 : f32 to vector<8x128xf32>
    %188 = arith.subf %187, %186 : vector<8x128xf32>
    %189 = arith.mulf %181, %188 : vector<8x128xf32>
    %190 = vector.extract_strided_slice %12 {offsets = [0, 22], sizes = [8, 1], strides = [1, 1]} : vector<8x32xf32> to vector<8x1xf32>
    %c22 = arith.constant 22 : index
    %c0_54 = arith.constant 0 : index
    %191 = vector.load %arg6[%c22, %c0_54] : memref<32x128xf32, #tpu.memory_space<vmem>>, vector<1x128xf32>
    %192 = vector.broadcast %190 : vector<8x1xf32> to vector<8x128xf32>
    %193 = vector.broadcast %191 : vector<1x128xf32> to vector<8x128xf32>
    %194 = arith.mulf %192, %193 : vector<8x128xf32>
    %cst_55 = arith.constant 1.000000e+00 : f32
    %195 = vector.broadcast %cst_55 : f32 to vector<8x128xf32>
    %196 = arith.subf %195, %194 : vector<8x128xf32>
    %197 = arith.mulf %189, %196 : vector<8x128xf32>
    %198 = vector.extract_strided_slice %12 {offsets = [0, 23], sizes = [8, 1], strides = [1, 1]} : vector<8x32xf32> to vector<8x1xf32>
    %c23 = arith.constant 23 : index
    %c0_56 = arith.constant 0 : index
    %199 = vector.load %arg6[%c23, %c0_56] : memref<32x128xf32, #tpu.memory_space<vmem>>, vector<1x128xf32>
    %200 = vector.broadcast %198 : vector<8x1xf32> to vector<8x128xf32>
    %201 = vector.broadcast %199 : vector<1x128xf32> to vector<8x128xf32>
    %202 = arith.mulf %200, %201 : vector<8x128xf32>
    %cst_57 = arith.constant 1.000000e+00 : f32
    %203 = vector.broadcast %cst_57 : f32 to vector<8x128xf32>
    %204 = arith.subf %203, %202 : vector<8x128xf32>
    %205 = arith.mulf %197, %204 : vector<8x128xf32>
    %206 = vector.extract_strided_slice %12 {offsets = [0, 24], sizes = [8, 1], strides = [1, 1]} : vector<8x32xf32> to vector<8x1xf32>
    %c24 = arith.constant 24 : index
    %c0_58 = arith.constant 0 : index
    %207 = vector.load %arg6[%c24, %c0_58] : memref<32x128xf32, #tpu.memory_space<vmem>>, vector<1x128xf32>
    %208 = vector.broadcast %206 : vector<8x1xf32> to vector<8x128xf32>
    %209 = vector.broadcast %207 : vector<1x128xf32> to vector<8x128xf32>
    %210 = arith.mulf %208, %209 : vector<8x128xf32>
    %cst_59 = arith.constant 1.000000e+00 : f32
    %211 = vector.broadcast %cst_59 : f32 to vector<8x128xf32>
    %212 = arith.subf %211, %210 : vector<8x128xf32>
    %213 = arith.mulf %205, %212 : vector<8x128xf32>
    %214 = vector.extract_strided_slice %12 {offsets = [0, 25], sizes = [8, 1], strides = [1, 1]} : vector<8x32xf32> to vector<8x1xf32>
    %c25 = arith.constant 25 : index
    %c0_60 = arith.constant 0 : index
    %215 = vector.load %arg6[%c25, %c0_60] : memref<32x128xf32, #tpu.memory_space<vmem>>, vector<1x128xf32>
    %216 = vector.broadcast %214 : vector<8x1xf32> to vector<8x128xf32>
    %217 = vector.broadcast %215 : vector<1x128xf32> to vector<8x128xf32>
    %218 = arith.mulf %216, %217 : vector<8x128xf32>
    %cst_61 = arith.constant 1.000000e+00 : f32
    %219 = vector.broadcast %cst_61 : f32 to vector<8x128xf32>
    %220 = arith.subf %219, %218 : vector<8x128xf32>
    %221 = arith.mulf %213, %220 : vector<8x128xf32>
    %222 = vector.extract_strided_slice %12 {offsets = [0, 26], sizes = [8, 1], strides = [1, 1]} : vector<8x32xf32> to vector<8x1xf32>
    %c26 = arith.constant 26 : index
    %c0_62 = arith.constant 0 : index
    %223 = vector.load %arg6[%c26, %c0_62] : memref<32x128xf32, #tpu.memory_space<vmem>>, vector<1x128xf32>
    %224 = vector.broadcast %222 : vector<8x1xf32> to vector<8x128xf32>
    %225 = vector.broadcast %223 : vector<1x128xf32> to vector<8x128xf32>
    %226 = arith.mulf %224, %225 : vector<8x128xf32>
    %cst_63 = arith.constant 1.000000e+00 : f32
    %227 = vector.broadcast %cst_63 : f32 to vector<8x128xf32>
    %228 = arith.subf %227, %226 : vector<8x128xf32>
    %229 = arith.mulf %221, %228 : vector<8x128xf32>
    %230 = vector.extract_strided_slice %12 {offsets = [0, 27], sizes = [8, 1], strides = [1, 1]} : vector<8x32xf32> to vector<8x1xf32>
    %c27 = arith.constant 27 : index
    %c0_64 = arith.constant 0 : index
    %231 = vector.load %arg6[%c27, %c0_64] : memref<32x128xf32, #tpu.memory_space<vmem>>, vector<1x128xf32>
    %232 = vector.broadcast %230 : vector<8x1xf32> to vector<8x128xf32>
    %233 = vector.broadcast %231 : vector<1x128xf32> to vector<8x128xf32>
    %234 = arith.mulf %232, %233 : vector<8x128xf32>
    %cst_65 = arith.constant 1.000000e+00 : f32
    %235 = vector.broadcast %cst_65 : f32 to vector<8x128xf32>
    %236 = arith.subf %235, %234 : vector<8x128xf32>
    %237 = arith.mulf %229, %236 : vector<8x128xf32>
    %238 = vector.extract_strided_slice %12 {offsets = [0, 28], sizes = [8, 1], strides = [1, 1]} : vector<8x32xf32> to vector<8x1xf32>
    %c28 = arith.constant 28 : index
    %c0_66 = arith.constant 0 : index
    %239 = vector.load %arg6[%c28, %c0_66] : memref<32x128xf32, #tpu.memory_space<vmem>>, vector<1x128xf32>
    %240 = vector.broadcast %238 : vector<8x1xf32> to vector<8x128xf32>
    %241 = vector.broadcast %239 : vector<1x128xf32> to vector<8x128xf32>
    %242 = arith.mulf %240, %241 : vector<8x128xf32>
    %cst_67 = arith.constant 1.000000e+00 : f32
    %243 = vector.broadcast %cst_67 : f32 to vector<8x128xf32>
    %244 = arith.subf %243, %242 : vector<8x128xf32>
    %245 = arith.mulf %237, %244 : vector<8x128xf32>
    %246 = vector.extract_strided_slice %12 {offsets = [0, 29], sizes = [8, 1], strides = [1, 1]} : vector<8x32xf32> to vector<8x1xf32>
    %c29 = arith.constant 29 : index
    %c0_68 = arith.constant 0 : index
    %247 = vector.load %arg6[%c29, %c0_68] : memref<32x128xf32, #tpu.memory_space<vmem>>, vector<1x128xf32>
    %248 = vector.broadcast %246 : vector<8x1xf32> to vector<8x128xf32>
    %249 = vector.broadcast %247 : vector<1x128xf32> to vector<8x128xf32>
    %250 = arith.mulf %248, %249 : vector<8x128xf32>
    %cst_69 = arith.constant 1.000000e+00 : f32
    %251 = vector.broadcast %cst_69 : f32 to vector<8x128xf32>
    %252 = arith.subf %251, %250 : vector<8x128xf32>
    %253 = arith.mulf %245, %252 : vector<8x128xf32>
    %254 = vector.extract_strided_slice %12 {offsets = [0, 30], sizes = [8, 1], strides = [1, 1]} : vector<8x32xf32> to vector<8x1xf32>
    %c30 = arith.constant 30 : index
    %c0_70 = arith.constant 0 : index
    %255 = vector.load %arg6[%c30, %c0_70] : memref<32x128xf32, #tpu.memory_space<vmem>>, vector<1x128xf32>
    %256 = vector.broadcast %254 : vector<8x1xf32> to vector<8x128xf32>
    %257 = vector.broadcast %255 : vector<1x128xf32> to vector<8x128xf32>
    %258 = arith.mulf %256, %257 : vector<8x128xf32>
    %cst_71 = arith.constant 1.000000e+00 : f32
    %259 = vector.broadcast %cst_71 : f32 to vector<8x128xf32>
    %260 = arith.subf %259, %258 : vector<8x128xf32>
    %261 = arith.mulf %253, %260 : vector<8x128xf32>
    %262 = vector.extract_strided_slice %12 {offsets = [0, 31], sizes = [8, 1], strides = [1, 1]} : vector<8x32xf32> to vector<8x1xf32>
    %c31 = arith.constant 31 : index
    %c0_72 = arith.constant 0 : index
    %263 = vector.load %arg6[%c31, %c0_72] : memref<32x128xf32, #tpu.memory_space<vmem>>, vector<1x128xf32>
    %264 = vector.broadcast %262 : vector<8x1xf32> to vector<8x128xf32>
    %265 = vector.broadcast %263 : vector<1x128xf32> to vector<8x128xf32>
    %266 = arith.mulf %264, %265 : vector<8x128xf32>
    %cst_73 = arith.constant 1.000000e+00 : f32
    %267 = vector.broadcast %cst_73 : f32 to vector<8x128xf32>
    %268 = arith.subf %267, %266 : vector<8x128xf32>
    %269 = arith.mulf %261, %268 : vector<8x128xf32>
    %c0_74 = arith.constant 0 : index
    %c0_75 = arith.constant 0 : index
    %270 = vector.load %arg5[%c0_74, %c0_75] : memref<8x128xf32, #tpu.memory_space<vmem>>, vector<8x128xf32>
    tpu.vector_store %arg5[%c0_74, %c0_75], %269 {strides = array<i32>} : memref<8x128xf32, #tpu.memory_space<vmem>>, vector<8x128xf32>,
    %c0_i32_76 = arith.constant 0 : i32
    %271 = arith.cmpi eq, %arg1, %c0_i32_76 : i32
    %272 = arith.extui %271 : i1 to i32
    %c0_i32_77 = arith.constant 0 : i32
    %273 = arith.cmpi ne, %272, %c0_i32_77 : i32
    scf.if %273 {
      %c0_78 = arith.constant 0 : index
      %c0_79 = arith.constant 0 : index
      %274 = vector.load %arg4[%c0_78, %c0_79] : memref<8x128xf32, #tpu.memory_space<vmem>>, vector<8x128xf32>
      tpu.vector_store %arg4[%c0_78, %c0_79], %269 {strides = array<i32>} : memref<8x128xf32, #tpu.memory_space<vmem>>, vector<8x128xf32>,
    } else {
    }
    return
  }
  func.func @transform_0(%arg0: i32, %arg1: i32) -> (i32, i32) {
    %c0_i32 = arith.constant 0 : i32
    %c0_i32_0 = arith.constant 0 : i32
    return %c0_i32, %arg1 : i32, i32
  }
  func.func @transform_1(%arg0: i32, %arg1: i32) -> (i32, i32) {
    %c0_i32 = arith.constant 0 : i32
    return %arg1, %arg0 : i32, i32
  }
  func.func @transform_2(%arg0: i32, %arg1: i32) -> (i32, i32) {
    %c0_i32 = arith.constant 0 : i32
    %c0_i32_0 = arith.constant 0 : i32
    return %c0_i32, %arg0 : i32, i32
  }
}

</mosaic_0001>

<bundles_post_ra>
// kernel: quasi_forward.1
= control target key start
LH: loop header
LB: loop body
LE: loop exit
PB: predicated region body
PF: predicated region fallthrough
CT: control target
= control target key end

     0   :  { %7 = vsyncpa [#allocation5], 0  ;;  %s604_s9 = smov [#allocation4]   ;;  %s706_s0 = inlined_call_operand.vmem [shape: f32[8,32], index: 0, kind: input, shape index: {}]   ;;  %s707_s1 = inlined_call_operand.hbm [shape: f32[32,128], index: 1, kind: input, shape index: {}]   ;;  %s708_s2 = inlined_call_operand.vmem [shape: f32[8,128], index: 2, kind: output, shape index: {}]  }
   0x1   :  { %s15_s10 = sshll.u32 %s604_s9, 4  ;;  %s580_s13 = scalar_lea.hbm %s707_s1, 512  ;;  %s16_s10 = int_to_ptr.vmem [resolvable:$true] %s15_s10 }
   0x2   :  { %p581_p0 = scmp.ne.s32.totalorder %s707_s1, %s580_s13  ;;  %p584_p1 = scmp.lt.u32.totalorder %s580_s13, %s707_s1 }
   0x4   :  { %p586_p2 = pnand %p584_p1, %p581_p0 }
   0x6   :  { %589 = shalt.err (!%p586_p2)
}
   0x7   :  { %s590_s18 = scalar_lea.vmem %s16_s10, 512  ;;  %p595_p4 = scmp.lt.s32.totalorder %s16_s10, %s16_s10 }
   0x8   :  { %p591_p3 = scmp.ne.s32.totalorder %s16_s10, %s590_s18  ;;  %p596_p5 = scmp.lt.s32.totalorder %s590_s18, %s590_s18 }
   0xa   :  { %p597_p6 = por %p596_p5, %p595_p4 }
   0xc   :  { %p598_p7 = pnand %p597_p6, %p591_p3 }
   0xe   :  { %601 = shalt.err (!%p598_p7)
}
   0xf   :  { %s605_s19 = smov 128   ;;  %s606_s20 = smov 8  }
  0x10   :  { %21 = dma.hbm_to_vmem [thread:$0]  %s707_s1, 512, %s16_s10, [#allocation5], %s605_s19, %s605_s19, %s606_s20  }
  0x11   :  { %602 = dma.done.wait [#allocation5], 512  }
  0x12   :  { %603 = vsyncadd [#allocation5], 4294966784  ;;  %v607_v0 = vmov 2   ;;  %v608_v1 = vmov 0   ;;  %v62_v2 = vld [vmem:[%s706_s0] sm:$0xff]  ;;  %v31_v6 = vld [vmem:[#allocation4 + $0x8] sm:$0xff] }
  0x13   :  { %533 = vset.pattern.permute.xlu1 %v607_v0  ;;  %531 = vset.pattern.permute.xlu0 %v608_v1  ;;  %v30_v3 = vld [vmem:[#allocation4] sm:$0xff]  ;;  %v669_v4 = vsub.f32 1.0, %v62_v2  ;;  %v461_v7 = vmul.f32 -1.442695, %v31_v6  ;;  %v609_v8 = vmov 3   ;;  %v610_v9 = vmov 1  }
  0x14   :  { %v460_v5 = vmul.f32 -1.442695, %v30_v3  ;;  %v611_v10 = vmov 4   ;;  %v612_v11 = vmov 5   ;;  %v613_v16 = vmov 6   ;;  %v32_v18 = vld [vmem:[#allocation4 + $0x10] sm:$0xff] }
  0x15   :  { %92 = vperm.xlu1 %533, %v669_v4   ;;  %68 = vperm.xlu0 %531, %v669_v4   ;;  %v614_v17 = vmov 8   ;;  %v462_v19 = vmul.f32 -1.442695, %v32_v18  ;;  %v615_v20 = vmov 7   ;;  %v616_v21 = vmov 11   ;;  %v33_v34 = vld [vmem:[#allocation4 + $0x18] sm:$0xff] }
  0x16   :  { %564 = vpow2.f32 %v460_v5  ;;  %v617_v24 = vmov 9   ;;  %v618_v25 = vmov 14   ;;  %v619_v27 = vmov 10  }
  0x17   :  { %566 = vpow2.f32 %v461_v7  ;;  %v620_v28 = vmov 17   ;;  %v621_v30 = vmov 12   ;;  %v622_v31 = vmov 20  }
  0x18   :  { %v623_v32 = vmov 13   ;;  %v624_v33 = vmov 23   ;;  %v463_v36 = vmul.f32 -1.442695, %v33_v34  ;;  %v625_v37 = vmov 15  }
  0x19   :  { %534 = vset.pattern.permute.xlu1 %v609_v8  ;;  %532 = vset.pattern.permute.xlu0 %v610_v9  ;;  %v626_v38 = vmov 26   ;;  %v627_v39 = vmov 16   ;;  %v628_v40 = vmov 29   ;;  %v629_v42 = vmov 18  }
  0x1a   :  { %104 = vperm.xlu1 %534, %v669_v4   ;;  %80 = vperm.xlu0 %532, %v669_v4   ;;  %v630_v44 = vmov 31   ;;  %v631_v45 = vmov 19   ;;  %v632_v46 = vmov 21   ;;  %v633_v48 = vmov 22  }
  0x1b   :  { %v634_v49 = vmov 24   ;;  %v635_v50 = vmov 25   ;;  %v636_v51 = vmov 27   ;;  %v637_v52 = vmov 28  }
  0x1c   :  { %v638_v53 = vmov 30  }
  0x1e   :  { %535 = vset.pattern.permute.xlu1 %v611_v10  ;;  %536 = vset.pattern.permute.xlu0 %v612_v11 }
  0x1f   :  { %116 = vperm.xlu1 %535, %v669_v4   ;;  %128 = vperm.xlu0 %536, %v669_v4  }
  0x20   :  { %v565_v12 = vpop.eup %564 }
  0x21   :  { %v567_v13 = vpop.eup %566  ;;  %v46_v14 = vadd.f32 1.0, %v565_v12 }
  0x22   :  { %v47_v15 = vadd.f32 1.0, %v567_v13 }
  0x23   :  { %568 = vrcp.f32 %v46_v14  ;;  %537 = vset.pattern.permute.xlu1 %v613_v16  ;;  %539 = vset.pattern.permute.xlu0 %v614_v17 }
  0x24   :  { %570 = vrcp.f32 %v47_v15  ;;  %140 = vperm.xlu1 %537, %v669_v4   ;;  %164 = vperm.xlu0 %539, %v669_v4  }
  0x25   :  { %572 = vpow2.f32 %v462_v19 }
  0x28   :  { %538 = vset.pattern.permute.xlu1 %v615_v20  ;;  %542 = vset.pattern.permute.xlu0 %v616_v21 }
  0x29   :  { %152 = vperm.xlu1 %538, %v669_v4   ;;  %200 = vperm.xlu0 %542, %v669_v4  }
  0x2d   :  { %v569_v22 = vpop.eup %568  ;;  %540 = vset.pattern.permute.xlu1 %v617_v24  ;;  %545 = vset.pattern.permute.xlu0 %v618_v25 }
  0x2e   :  { %v571_v23 = vpop.eup %570  ;;  %58 = vst [vmem:[#allocation3] sm:$0xff] %v569_v22  ;;  %176 = vperm.xlu1 %540, %v669_v4   ;;  %236 = vperm.xlu0 %545, %v669_v4  }
  0x2f   :  { %59 = vst [vmem:[#allocation3 + $0x8] sm:$0xff] %v571_v23  ;;  %v573_v26 = vpop.eup %572 }
  0x30   :  { %v48_v29 = vadd.f32 1.0, %v573_v26 }
  0x32   :  { %541 = vset.pattern.permute.xlu1 %v619_v27  ;;  %548 = vset.pattern.permute.xlu0 %v620_v28  ;;  %574 = vrcp.f32 %v48_v29 }
  0x33   :  { %188 = vperm.xlu1 %541, %v669_v4   ;;  %272 = vperm.xlu0 %548, %v669_v4   ;;  %576 = vpow2.f32 %v463_v36 }
  0x35   :  { %v464_v54 = vld [vmem:[#allocation3] ss:$0 sm:$0xff]  ;;  %v466_v58 = vld [vmem:[#allocation3 + $0x2] ss:$0 sm:$0xff]  ;;  %v465_v59 = vld [vmem:[#allocation3 + $0x1] ss:$0 sm:$0xff] }
  0x36   :  { %v467_v61 = vld [vmem:[#allocation3 + $0x3] ss:$0 sm:$0xff]  ;;  %v468_v5 = vld [vmem:[#allocation3 + $0x4] ss:$0 sm:$0xff]  ;;  %v469_v6 = vld [vmem:[#allocation3 + $0x5] ss:$0 sm:$0xff] }
  0x37   :  { %543 = vset.pattern.permute.xlu1 %v621_v30  ;;  %551 = vset.pattern.permute.xlu0 %v622_v31  ;;  %v470_v15 = vld [vmem:[#allocation3 + $0x6] ss:$0 sm:$0xff]  ;;  %v471_v21 = vld [vmem:[#allocation3 + $0x7] ss:$0 sm:$0xff]  ;;  %v472_v23 = vld [vmem:[#allocation3 + $0x8] ss:$0 sm:$0xff] }
  0x38   :  { %212 = vperm.xlu1 %543, %v669_v4   ;;  %308 = vperm.xlu0 %551, %v669_v4   ;;  %v473_v31 = vld [vmem:[#allocation3 + $0x9] ss:$0 sm:$0xff]  ;;  %v474_v36 = vld [vmem:[#allocation3 + $0xa] ss:$0 sm:$0xff] }
  0x3c   :  { %544 = vset.pattern.permute.xlu1 %v623_v32  ;;  %554 = vset.pattern.permute.xlu0 %v624_v33  ;;  %v575_v35 = vpop.eup %574 }
  0x3d   :  { %224 = vperm.xlu1 %544, %v669_v4   ;;  %344 = vperm.xlu0 %554, %v669_v4   ;;  %60 = vst [vmem:[#allocation3 + $0x10] sm:$0xff] %v575_v35  ;;  %v577_v41 = vpop.eup %576 }
  0x3e   :  { %v49_v43 = vadd.f32 1.0, %v577_v41 }
  0x40   :  { %578 = vrcp.f32 %v49_v43 }
  0x41   :  { %546 = vset.pattern.permute.xlu1 %v625_v37  ;;  %557 = vset.pattern.permute.xlu0 %v626_v38  ;;  %v475_v38 = vld [vmem:[#allocation3 + $0xb] ss:$0 sm:$0xff] }
  0x42   :  { %248 = vperm.xlu1 %546, %v669_v4   ;;  %380 = vperm.xlu0 %557, %v669_v4  }
  0x46   :  { %547 = vset.pattern.permute.xlu1 %v627_v39  ;;  %560 = vset.pattern.permute.xlu0 %v628_v40 }
  0x47   :  { %260 = vperm.xlu1 %547, %v669_v4   ;;  %416 = vperm.xlu0 %560, %v669_v4  }
  0x4a   :  { %v579_v47 = vpop.eup %578 }
  0x4b   :  { %549 = vset.pattern.permute.xlu1 %v629_v42  ;;  %563 = vset.pattern.permute.xlu0 %v630_v44  ;;  %61 = vst [vmem:[#allocation3 + $0x18] sm:$0xff] %v579_v47 }
  0x4c   :  { %284 = vperm.xlu1 %549, %v669_v4  }
  0x50   :  { %550 = vset.pattern.permute.xlu1 %v631_v45 }
  0x51   :  { %296 = vperm.xlu1 %550, %v669_v4  }
  0x55   :  { %552 = vset.pattern.permute.xlu1 %v632_v46  ;;  %v476_v46 = vld [vmem:[#allocation3 + $0xc] ss:$0 sm:$0xff] }
  0x56   :  { %320 = vperm.xlu1 %552, %v669_v4  }
  0x5a   :  { %553 = vset.pattern.permute.xlu1 %v633_v48 }
  0x5b   :  { %332 = vperm.xlu1 %553, %v669_v4  }
  0x5f   :  { %555 = vset.pattern.permute.xlu1 %v634_v49 }
  0x60   :  { %356 = vperm.xlu1 %555, %v669_v4  }
  0x64   :  { %556 = vset.pattern.permute.xlu1 %v635_v50 }
  0x65   :  { %368 = vperm.xlu1 %556, %v669_v4  }
  0x69   :  { %558 = vset.pattern.permute.xlu1 %v636_v51  ;;  %v477_v51 = vld [vmem:[#allocation3 + $0xd] ss:$0 sm:$0xff] }
  0x6a   :  { %392 = vperm.xlu1 %558, %v669_v4  }
  0x6e   :  { %559 = vset.pattern.permute.xlu1 %v637_v52 }
  0x6f   :  { %404 = vperm.xlu1 %559, %v669_v4  }
  0x73   :  { %561 = vset.pattern.permute.xlu1 %v638_v53  ;;  %v478_v53 = vld [vmem:[#allocation3 + $0xe] ss:$0 sm:$0xff] }
  0x74   :  { %428 = vperm.xlu1 %561, %v669_v4  }
  0x78   :  { %562 = vset.pattern.permute.xlu1 %v630_v44 }
  0x79   :  { %440 = vperm.xlu1 %562, %v669_v4  }
  0x94   :  { %v93_v55 = vpop.permute.xlu1 %92  ;;  %v69_v56 = vpop.permute.xlu0 %68 }
  0x95   :  { %v75_v57 = vmul.f32 %v464_v54, %v69_v56  ;;  %v99_v63 = vmul.f32 %v466_v58, %v93_v55 }
  0x97   :  { %v76_v0 = vsub.f32 1.0, %v75_v57  ;;  %v100_v7 = vsub.f32 1.0, %v99_v63 }
  0x99   :  { %v105_v60 = vpop.permute.xlu1 %104  ;;  %v81_v62 = vpop.permute.xlu0 %80 }
  0x9a   :  { %v87_v1 = vmul.f32 %v465_v59, %v81_v62  ;;  %v111_v2 = vmul.f32 %v467_v61, %v105_v60  ;;  %v479_v61 = vld [vmem:[#allocation3 + $0xf] ss:$0 sm:$0xff] }
  0x9c   :  { %v88_v3 = vsub.f32 1.0, %v87_v1  ;;  %v112_v12 = vsub.f32 1.0, %v111_v2  ;;  %v480_v2 = vld [vmem:[#allocation3 + $0x10] ss:$0 sm:$0xff] }
  0x9e   :  { %v89_v8 = vmul.f32 %v88_v3, %v76_v0  ;;  %v117_v9 = vpop.permute.xlu1 %116  ;;  %v129_v4 = vpop.permute.xlu0 %128 }
  0x9f   :  { %v123_v10 = vmul.f32 %v468_v5, %v117_v9  ;;  %v135_v11 = vmul.f32 %v469_v6, %v129_v4  ;;  %v481_v5 = vld [vmem:[#allocation3 + $0x11] ss:$0 sm:$0xff] }
  0xa0   :  { %v101_v13 = vmul.f32 %v100_v7, %v89_v8 }
  0xa1   :  { %v124_v14 = vsub.f32 1.0, %v123_v10  ;;  %v136_v17 = vsub.f32 1.0, %v135_v11 }
  0xa2   :  { %v113_v16 = vmul.f32 %v112_v12, %v101_v13  ;;  %v482_v12 = vld [vmem:[#allocation3 + $0x12] ss:$0 sm:$0xff] }
  0xa3   :  { %v141_v18 = vpop.permute.xlu1 %140  ;;  %v165_v22 = vpop.permute.xlu0 %164 }
  0xa4   :  { %v125_v19 = vmul.f32 %v124_v14, %v113_v16  ;;  %v147_v20 = vmul.f32 %v470_v15, %v141_v18  ;;  %v171_v28 = vmul.f32 %v472_v23, %v165_v22 }
  0xa6   :  { %v137_v24 = vmul.f32 %v136_v17, %v125_v19  ;;  %v148_v25 = vsub.f32 1.0, %v147_v20  ;;  %v172_v33 = vsub.f32 1.0, %v171_v28  ;;  %v483_v17 = vld [vmem:[#allocation3 + $0x13] ss:$0 sm:$0xff]  ;;  %v484_v19 = vld [vmem:[#allocation3 + $0x14] ss:$0 sm:$0xff] }
  0xa8   :  { %v153_v26 = vpop.permute.xlu1 %152  ;;  %v149_v29 = vmul.f32 %v148_v25, %v137_v24  ;;  %v201_v37 = vpop.permute.xlu0 %200 }
  0xa9   :  { %v159_v27 = vmul.f32 %v471_v21, %v153_v26  ;;  %v207_v43 = vmul.f32 %v475_v38, %v201_v37 }
  0xab   :  { %v160_v30 = vsub.f32 1.0, %v159_v27  ;;  %v208_v48 = vsub.f32 1.0, %v207_v43  ;;  %v485_v27 = vld [vmem:[#allocation3 + $0x15] ss:$0 sm:$0xff] }
  0xad   :  { %v161_v32 = vmul.f32 %v160_v30, %v149_v29  ;;  %v177_v34 = vpop.permute.xlu1 %176  ;;  %v237_v52 = vpop.permute.xlu0 %236 }
  0xae   :  { %v183_v35 = vmul.f32 %v473_v31, %v177_v34  ;;  %v243_v58 = vmul.f32 %v478_v53, %v237_v52  ;;  %v487_v34 = vld [vmem:[#allocation3 + $0x17] ss:$0 sm:$0xff] }
  0xaf   :  { %v173_v39 = vmul.f32 %v172_v33, %v161_v32  ;;  %v486_v32 = vld [vmem:[#allocation3 + $0x16] ss:$0 sm:$0xff] }
  0xb0   :  { %v184_v40 = vsub.f32 1.0, %v183_v35  ;;  %v244_v63 = vsub.f32 1.0, %v243_v58 }
  0xb2   :  { %v189_v41 = vpop.permute.xlu1 %188  ;;  %v185_v44 = vmul.f32 %v184_v40, %v173_v39  ;;  %v273_v3 = vpop.permute.xlu0 %272 }
  0xb3   :  { %v195_v42 = vmul.f32 %v474_v36, %v189_v41  ;;  %v279_v4 = vmul.f32 %v481_v5, %v273_v3 }
  0xb5   :  { %v196_v45 = vsub.f32 1.0, %v195_v42  ;;  %v280_v14 = vsub.f32 1.0, %v279_v4  ;;  %v488_v42 = vld [vmem:[#allocation3 + $0x18] ss:$0 sm:$0xff] }
  0xb7   :  { %v197_v47 = vmul.f32 %v196_v45, %v185_v44  ;;  %v213_v49 = vpop.permute.xlu1 %212  ;;  %v309_v18 = vpop.permute.xlu0 %308 }
  0xb8   :  { %v219_v50 = vmul.f32 %v476_v46, %v213_v49  ;;  %v315_v24 = vmul.f32 %v484_v19, %v309_v18  ;;  %v490_v49 = vld [vmem:[#allocation3 + $0x1a] ss:$0 sm:$0xff] }
  0xb9   :  { %v209_v54 = vmul.f32 %v208_v48, %v197_v47  ;;  %v489_v47 = vld [vmem:[#allocation3 + $0x19] ss:$0 sm:$0xff] }
  0xba   :  { %v220_v55 = vsub.f32 1.0, %v219_v50  ;;  %v316_v29 = vsub.f32 1.0, %v315_v24 }
  0xbc   :  { %v225_v56 = vpop.permute.xlu1 %224  ;;  %v221_v59 = vmul.f32 %v220_v55, %v209_v54  ;;  %v345_v33 = vpop.permute.xlu0 %344 }
  0xbd   :  { %v231_v57 = vmul.f32 %v477_v51, %v225_v56  ;;  %v351_v39 = vmul.f32 %v487_v34, %v345_v33 }
  0xbf   :  { %v232_v60 = vsub.f32 1.0, %v231_v57  ;;  %v352_v44 = vsub.f32 1.0, %v351_v39  ;;  %v491_v57 = vld [vmem:[#allocation3 + $0x1b] ss:$0 sm:$0xff] }
  0xc1   :  { %v233_v62 = vmul.f32 %v232_v60, %v221_v59  ;;  %v249_v0 = vpop.permute.xlu1 %248  ;;  %v381_v48 = vpop.permute.xlu0 %380 }
  0xc2   :  { %v255_v1 = vmul.f32 %v479_v61, %v249_v0  ;;  %v387_v54 = vmul.f32 %v490_v49, %v381_v48  ;;  %v493_v0 = vld [vmem:[#allocation3 + $0x1d] ss:$0 sm:$0xff] }
  0xc3   :  { %v245_v6 = vmul.f32 %v244_v63, %v233_v62  ;;  %v492_v62 = vld [vmem:[#allocation3 + $0x1c] ss:$0 sm:$0xff] }
  0xc4   :  { %v256_v7 = vsub.f32 1.0, %v255_v1  ;;  %v388_v59 = vsub.f32 1.0, %v387_v54 }
  0xc6   :  { %v261_v8 = vpop.permute.xlu1 %260  ;;  %v257_v10 = vmul.f32 %v256_v7, %v245_v6  ;;  %v417_v63 = vpop.permute.xlu0 %416 }
  0xc7   :  { %v267_v9 = vmul.f32 %v480_v2, %v261_v8  ;;  %v423_v6 = vmul.f32 %v493_v0, %v417_v63 }
  0xc9   :  { %v268_v11 = vsub.f32 1.0, %v267_v9  ;;  %v494_v9 = vld [vmem:[#allocation3 + $0x1e] ss:$0 sm:$0xff] }
  0xcb   :  { %v269_v13 = vmul.f32 %v268_v11, %v257_v10  ;;  %v285_v15 = vpop.permute.xlu1 %284  ;;  %v424_v10 = vsub.f32 1.0, %v423_v6 }
  0xcc   :  { %v291_v16 = vmul.f32 %v482_v12, %v285_v15 }
  0xcd   :  { %v281_v20 = vmul.f32 %v280_v14, %v269_v13  ;;  %v495_v13 = vld [vmem:[#allocation3 + $0x1f] ss:$0 sm:$0xff] }
  0xce   :  { %v292_v21 = vsub.f32 1.0, %v291_v16 }
  0xd0   :  { %v297_v22 = vpop.permute.xlu1 %296  ;;  %v293_v25 = vmul.f32 %v292_v21, %v281_v20 }
  0xd1   :  { %v303_v23 = vmul.f32 %v483_v17, %v297_v22 }
  0xd3   :  { %v304_v26 = vsub.f32 1.0, %v303_v23 }
  0xd5   :  { %v305_v28 = vmul.f32 %v304_v26, %v293_v25  ;;  %v321_v30 = vpop.permute.xlu1 %320 }
  0xd6   :  { %v327_v31 = vmul.f32 %v485_v27, %v321_v30 }
  0xd7   :  { %v317_v35 = vmul.f32 %v316_v29, %v305_v28 }
  0xd8   :  { %v328_v36 = vsub.f32 1.0, %v327_v31 }
  0xda   :  { %v333_v37 = vpop.permute.xlu1 %332  ;;  %v329_v40 = vmul.f32 %v328_v36, %v317_v35 }
  0xdb   :  { %v339_v38 = vmul.f32 %v486_v32, %v333_v37 }
  0xdd   :  { %v340_v41 = vsub.f32 1.0, %v339_v38 }
  0xdf   :  { %v341_v43 = vmul.f32 %v340_v41, %v329_v40  ;;  %v357_v45 = vpop.permute.xlu1 %356 }
  0xe0   :  { %v363_v46 = vmul.f32 %v488_v42, %v357_v45 }
  0xe1   :  { %v353_v50 = vmul.f32 %v352_v44, %v341_v43 }
  0xe2   :  { %v364_v51 = vsub.f32 1.0, %v363_v46 }
  0xe4   :  { %v369_v52 = vpop.permute.xlu1 %368  ;;  %v365_v55 = vmul.f32 %v364_v51, %v353_v50 }
  0xe5   :  { %v375_v53 = vmul.f32 %v489_v47, %v369_v52 }
  0xe7   :  { %v376_v56 = vsub.f32 1.0, %v375_v53 }
  0xe9   :  { %v377_v58 = vmul.f32 %v376_v56, %v365_v55  ;;  %v393_v60 = vpop.permute.xlu1 %392 }
  0xea   :  { %v399_v61 = vmul.f32 %v491_v57, %v393_v60 }
  0xeb   :  { %v389_v1 = vmul.f32 %v388_v59, %v377_v58 }
  0xec   :  { %v400_v2 = vsub.f32 1.0, %v399_v61 }
  0xee   :  { %v405_v3 = vpop.permute.xlu1 %404  ;;  %v401_v7 = vmul.f32 %v400_v2, %v389_v1 }
  0xef   :  { %v411_v5 = vmul.f32 %v492_v62, %v405_v3 }
  0xf1   :  { %v412_v8 = vsub.f32 1.0, %v411_v5 }
  0xf3   :  { %v413_v4 = vmul.f32 %v412_v8, %v401_v7  ;;  %v429_v11 = vpop.permute.xlu1 %428 }
  0xf4   :  { %v435_v12 = vmul.f32 %v494_v9, %v429_v11 }
  0xf5   :  { %v425_v14 = vmul.f32 %v424_v10, %v413_v4 }
  0xf6   :  { %v436_v15 = vsub.f32 1.0, %v435_v12 }
  0xf8   :  { %v441_v16 = vpop.permute.xlu1 %440  ;;  %v437_v18 = vmul.f32 %v436_v15, %v425_v14 }
  0xf9   :  { %v447_v17 = vmul.f32 %v495_v13, %v441_v16 }
  0xfb   :  { %v448_v19 = vsub.f32 1.0, %v447_v17 }
  0xfd   :  { %v449_v20 = vmul.f32 %v448_v19, %v437_v18 }
  0xff   :  { %454 = vst [vmem:[%s708_s2] sm:$0xff] %v449_v20 }
 0x100   :  { %459 = vsyncpa [#allocation5], 1 }

</bundles_post_ra>
